<compile_context>
chip_gen: v6e
topology: v6e:2x2x1
jax: 0.10.0
libtpu: 0.0.40
codegen_flags: <defaults>
</compile_context>

<pallas_src>
import functools

import numpy as np
import jax
import jax.numpy as jnp
from jax.experimental import pallas as pl
from jax.experimental.pallas import tpu as pltpu

# --- static problem geometry (from the module: view(B,32,3) forces 6x10) ----
H, W = 6, 10                   # input spatial
OH1, OW1 = H - 2, W - 2        # conv1 output: 4, 8
OH2, OW2 = OH1 - 2, OW1 - 2    # conv2 output: 2, 6
PW = OW2 // 2                  # pooled width: 3 (== conv1d taps)
KP = 128                       # conv1 contraction: 81 raw values + 1 one + pad
H1W = 256                      # h1 width: 144 conv1 cols + 1 ones col + pad
H2W = 40                       # h2 width: 32 conv2 channels + 1 ones col + pad
NPAD = 128                     # lane-dense padded output width (real = 64)
ONES_COL = 81                  # patches column holding constant 1.0
H1_ONES = 144                  # h1 column holding constant 1.0
H2_ONES = 32                   # h2 column holding constant 1.0


def member_encoder_kernel(p_ref, w1_ref, w2_ref, w1d_ref, out_ref, *, bp):
    f32 = jnp.float32
    npb = PW * bp                            # rows per 2x2 pool-window offset

    # conv1 + bias + ReLU, evaluated for all 9 conv2 taps of every conv2
    # output position at once (block-diagonal weight, K=128). Column H1_ONES
    # of the result is a constant 1 (carries conv2's bias into the next dot).
    h1 = jnp.maximum(
        jnp.dot(p_ref[...], w1_ref[...], preferred_element_type=f32), 0.0)

    # conv2 + bias + ReLU: single fused matmul (K=256, 144 real columns).
    # Column H2_ONES is a constant 1 (carries conv1d's bias onward).
    h2 = jnp.maximum(
        jnp.dot(h1, w2_ref[...], preferred_element_type=f32), 0.0)

    # MaxPool2d(2,2): rows ordered (pool-window offset q, pw, b) with bp a
    # multiple of 8, so this is a max of four 8-aligned contiguous slabs.
    pooled = jnp.maximum(
        jnp.maximum(h2[0 * npb:1 * npb], h2[1 * npb:2 * npb]),
        jnp.maximum(h2[2 * npb:3 * npb], h2[3 * npb:4 * npb]))    # (npb, H2W)

    # view(B,32,3) + Conv1d(32,64,3): one matmul against a weight holding the
    # three taps in 128-wide lane blocks, then the (row-block k, lane-block k)
    # diagonal sum; conv1d bias rides in the tap-0 block via the ones column.
    z = jnp.dot(pooled, w1d_ref[...], preferred_element_type=f32)  # (npb, 384)
    out_ref[...] = (z[0 * bp:1 * bp, 0 * NPAD:1 * NPAD]
                    + z[1 * bp:2 * bp, 1 * NPAD:2 * NPAD]
                    + z[2 * bp:3 * bp, 2 * NPAD:3 * NPAD])         # (bp, 128)
    # AdaptiveMaxPool1d(1) over a length-1 sequence is the identity.


def prepare_params(W1, b1, W2, b2, W1d, b1d, batch):
    """One-time (model init) repacking of parameters + gather index map.

    Returns (params_dict, padded_batch). Nothing here runs per forward call.
    """
    W1 = np.asarray(W1, np.float32); b1 = np.asarray(b1, np.float32)
    W2 = np.asarray(W2, np.float32); b2 = np.asarray(b2, np.float32)
    W1d = np.asarray(W1d, np.float32); b1d = np.asarray(b1d, np.float32)

    bp = max(8, -(-batch // 8) * 8)          # batch padded to multiple of 8

    # conv1: OIHW (16,1,3,3) -> (ih*3+iw, cout), block-diagonal over the 9
    # conv2 taps; bias folded into row ONES_COL; ones column for conv2 bias.
    w1_flat = W1.transpose(2, 3, 1, 0).reshape(9, 16)
    w1_big = np.zeros((KP, H1W), np.float32)
    for t in range(9):
        w1_big[t * 9:(t + 1) * 9, t * 16:(t + 1) * 16] = w1_flat
        w1_big[ONES_COL, t * 16:(t + 1) * 16] = b1
    w1_big[ONES_COL, H1_ONES] = 1.0

    # conv2: OIHW (32,16,3,3) -> ((kh*3+kw)*16+cin, cout); bias in the ones
    # row; its own ones column feeds the conv1d bias.
    w2_big = np.zeros((H1W, H2W), np.float32)
    w2_big[:144, :32] = W2.transpose(2, 3, 1, 0).reshape(144, 32)
    w2_big[H1_ONES, :32] = b2
    w2_big[H1_ONES, H2_ONES] = 1.0

    # conv1d: OIK (64,32,3) -> (cin, k*128+cout), one 128-lane block per tap;
    # bias only in the tap-0 block (added exactly once by the diagonal sum).
    w1d_big = np.zeros((H2W, PW * NPAD), np.float32)
    for k in range(PW):
        w1d_big[:32, k * NPAD:k * NPAD + 64] = W1d[:, :, k].T
    w1d_big[H2_ONES, 0:64] = b1d

    # Flat gather indices building the conv2 im2col matrix (conv1's 3x3
    # patches inlined: 81 raw values per row) straight from x.reshape(-1)
    # concatenated with [1.0, 0.0]. Row index: r = (q*PW + pw)*bp + b,
    # q = oh2*2 + j (2x2 pool-window offset, outermost), ow2 = 2*pw + j.
    nx = batch * H * W
    idx = np.full((4 * PW * bp, KP), nx + 1, np.int32)   # default -> 0.0 slot
    for q in range(4):
        oh2, j = q // 2, q % 2
        for pw in range(PW):
            ow2 = 2 * pw + j
            for b in range(bp):
                r = (q * PW + pw) * bp + b
                idx[r, ONES_COL] = nx                     # 1.0 slot
                if b < batch:
                    for t in range(9):                    # conv2 tap
                        kh2, kw2 = t // 3, t % 3
                        for ih in range(3):               # conv1 tap
                            for iw in range(3):
                                idx[r, t * 9 + ih * 3 + iw] = (
                                    b * H * W + (oh2 + kh2 + ih) * W
                                    + (ow2 + kw2 + iw))

    params = {
        "w1_big": jnp.asarray(w1_big),
        "w2_big": jnp.asarray(w2_big),
        "w1d_big": jnp.asarray(w1d_big),
        "idx": jnp.asarray(idx),
        "aug": jnp.asarray(np.array([1.0, 0.0], np.float32)),
    }
    return params, bp


@functools.partial(jax.jit, static_argnums=(2, 3))
def member_encoder_forward(x, params, batch, bp):
    """x: (batch, 6, 10) float32 -> (batch, 64) float32."""
    # Per-call glue: reshape + concat + ONE gather, then the kernel.
    x_aug = jnp.concatenate([x.reshape(-1), params["aug"]])
    patches = x_aug[params["idx"]]                        # (4*PW*bp, 128)

    out = pl.pallas_call(
        functools.partial(member_encoder_kernel, bp=bp),
        out_shape=jax.ShapeDtypeStruct((bp, NPAD), jnp.float32),
        in_specs=[pl.BlockSpec(memory_space=pltpu.MemorySpace.VMEM)] * 4,
        out_specs=pl.BlockSpec(memory_space=pltpu.MemorySpace.VMEM),
    )(patches, params["w1_big"], params["w2_big"], params["w1d_big"])
    # TODO(synk): if batch grows to hundreds+, add a grid over the row axis
    # (multiple-of-8 row tiles, lane-dense K) with
    # dimension_semantics=("parallel",) so BlockSpec pipelining and v7x's
    # second TensorCore are used; footprint today is <0.5 MiB so no tiling.
    return out[:batch, :64]


def reference_forward(x, W1, b1, W2, b2, W1d, b1d):
    """Pure-JAX reference mirroring the PyTorch forward (NCHW)."""
    dn = ('NCHW', 'OIHW', 'NCHW')
    h = x[:, None, :, :]
    h = jax.lax.conv_general_dilated(h, W1, (1, 1), 'VALID',
                                     dimension_numbers=dn)
    h = jax.nn.relu(h + b1[None, :, None, None])
    h = jax.lax.conv_general_dilated(h, W2, (1, 1), 'VALID',
                                     dimension_numbers=dn)
    h = jax.nn.relu(h + b2[None, :, None, None])
    h = jax.lax.reduce_window(h, -jnp.inf, jax.lax.max,
                              (1, 1, 2, 2), (1, 1, 2, 2), 'VALID')
    h = h.reshape(h.shape[0], 32, 3)
    h = jax.lax.conv_general_dilated(h, W1d, (1,), 'VALID',
                                     dimension_numbers=('NCH', 'OIH', 'NCH'))
    h = h + b1d[None, :, None]
    h = jnp.max(h, axis=-1)            # AdaptiveMaxPool1d(1) + flatten
    return h


if __name__ == "__main__":
    key = jax.random.PRNGKey(0)
    ks = jax.random.split(key, 7)

    B = 2   # batch
    # Deterministic synthetic parameters (shapes from the module __init__).
    W1 = 0.2 * jax.random.normal(ks[0], (16, 1, 3, 3), jnp.float32)
    b1 = 0.1 * jax.random.normal(ks[1], (16,), jnp.float32)
    W2 = 0.1 * jax.random.normal(ks[2], (32, 16, 3, 3), jnp.float32)
    b2 = 0.1 * jax.random.normal(ks[3], (32,), jnp.float32)
    W1d = 0.1 * jax.random.normal(ks[4], (64, 32, 3), jnp.float32)
    b1d = 0.1 * jax.random.normal(ks[5], (64,), jnp.float32)

    x = jax.random.normal(ks[6], (B, H, W), jnp.float32)

    # One-time init: parameter repacking + gather index map (off hot path).
    params, bp = prepare_params(W1, b1, W2, b2, W1d, b1d, B)

    out = jax.block_until_ready(member_encoder_forward(x, params, B, bp))
    ref = jax.block_until_ready(reference_forward(x, W1, b1, W2, b2, W1d, b1d))

    assert out.shape == (B, 64)
    assert jnp.allclose(out, ref, rtol=1e-4, atol=1e-4), (
        f"max abs err {jnp.max(jnp.abs(out - ref))}")

    print("KERNEL_OK")
</pallas_src>

<mosaic_0001>
module attributes {stable_mosaic.version = 11 : i64} {
  func.func @member_encoder_kernel(%arg0: memref<96x128xf32, #tpu.memory_space<vmem>>, %arg1: memref<128x256xf32, #tpu.memory_space<vmem>>, %arg2: memref<256x40xf32, #tpu.memory_space<vmem>>, %arg3: memref<40x384xf32, #tpu.memory_space<vmem>>, %arg4: memref<8x128xf32, #tpu.memory_space<vmem>>) attributes {dimension_semantics = [], scalar_prefetch = 0 : i64, scratch_operands = 0 : i64, tpu.core_type = #tpu.core_type<tc>} {
    %c0 = arith.constant 0 : index
    %c0_0 = arith.constant 0 : index
    %0 = vector.load %arg0[%c0, %c0_0] : memref<96x128xf32, #tpu.memory_space<vmem>>, vector<96x128xf32>
    %c0_1 = arith.constant 0 : index
    %c0_2 = arith.constant 0 : index
    %1 = vector.load %arg1[%c0_1, %c0_2] : memref<128x256xf32, #tpu.memory_space<vmem>>, vector<128x256xf32>
    %cst = arith.constant dense<0.000000e+00> : vector<96x256xf32>
    %2 = tpu.matmul %0, %1, %cst {dimension_numbers = #tpu.dot_dimension_numbers<[1], [0], [0], [1], [0, 0, 1, 1], [], []>} : vector<96x128xf32>, vector<128x256xf32>, vector<96x256xf32> -> vector<96x256xf32>
    %cst_3 = arith.constant 0.000000e+00 : f32
    %3 = vector.broadcast %cst_3 : f32 to vector<96x256xf32>
    %4 = arith.maximumf %2, %3 : vector<96x256xf32>
    %c0_4 = arith.constant 0 : index
    %c0_5 = arith.constant 0 : index
    %5 = vector.load %arg2[%c0_4, %c0_5] : memref<256x40xf32, #tpu.memory_space<vmem>>, vector<256x40xf32>
    %cst_6 = arith.constant dense<0.000000e+00> : vector<96x40xf32>
    %6 = tpu.matmul %4, %5, %cst_6 {dimension_numbers = #tpu.dot_dimension_numbers<[1], [0], [0], [1], [0, 0, 1, 1], [], []>} : vector<96x256xf32>, vector<256x40xf32>, vector<96x40xf32> -> vector<96x40xf32>
    %cst_7 = arith.constant 0.000000e+00 : f32
    %7 = vector.broadcast %cst_7 : f32 to vector<96x40xf32>
    %8 = arith.maximumf %6, %7 : vector<96x40xf32>
    %9 = vector.extract_strided_slice %8 {offsets = [0, 0], sizes = [24, 40], strides = [1, 1]} : vector<96x40xf32> to vector<24x40xf32>
    %10 = vector.extract_strided_slice %8 {offsets = [24, 0], sizes = [24, 40], strides = [1, 1]} : vector<96x40xf32> to vector<24x40xf32>
    %11 = arith.maximumf %9, %10 : vector<24x40xf32>
    %12 = vector.extract_strided_slice %8 {offsets = [48, 0], sizes = [24, 40], strides = [1, 1]} : vector<96x40xf32> to vector<24x40xf32>
    %13 = vector.extract_strided_slice %8 {offsets = [72, 0], sizes = [24, 40], strides = [1, 1]} : vector<96x40xf32> to vector<24x40xf32>
    %14 = arith.maximumf %12, %13 : vector<24x40xf32>
    %15 = arith.maximumf %11, %14 : vector<24x40xf32>
    %c0_8 = arith.constant 0 : index
    %c0_9 = arith.constant 0 : index
    %16 = vector.load %arg3[%c0_8, %c0_9] : memref<40x384xf32, #tpu.memory_space<vmem>>, vector<40x384xf32>
    %cst_10 = arith.constant dense<0.000000e+00> : vector<24x384xf32>
    %17 = tpu.matmul %15, %16, %cst_10 {dimension_numbers = #tpu.dot_dimension_numbers<[1], [0], [0], [1], [0, 0, 1, 1], [], []>} : vector<24x40xf32>, vector<40x384xf32>, vector<24x384xf32> -> vector<24x384xf32>
    %18 = vector.extract_strided_slice %17 {offsets = [0, 0], sizes = [8, 128], strides = [1, 1]} : vector<24x384xf32> to vector<8x128xf32>
    %19 = vector.extract_strided_slice %17 {offsets = [8, 128], sizes = [8, 128], strides = [1, 1]} : vector<24x384xf32> to vector<8x128xf32>
    %20 = arith.addf %18, %19 : vector<8x128xf32>
    %21 = vector.extract_strided_slice %17 {offsets = [16, 256], sizes = [8, 128], strides = [1, 1]} : vector<24x384xf32> to vector<8x128xf32>
    %22 = arith.addf %20, %21 : vector<8x128xf32>
    %c0_11 = arith.constant 0 : index
    %c0_12 = arith.constant 0 : index
    %23 = vector.load %arg4[%c0_11, %c0_12] : memref<8x128xf32, #tpu.memory_space<vmem>>, vector<8x128xf32>
    tpu.vector_store %arg4[%c0_11, %c0_12], %22 {strides = array<i32>} : memref<8x128xf32, #tpu.memory_space<vmem>>, vector<8x128xf32>,
    return
  }
}

</mosaic_0001>

<bundles_post_ra>
// kernel: member_encoder_forward.1
= control target key start
LH: loop header
LB: loop body
LE: loop exit
PB: predicated region body
PF: predicated region fallthrough
CT: control target
= control target key end

     0   :  { %v692_v3 = vmov 0.0   ;;  %vm693_vm0 = vmmov 0   ;;  %vm415_vm1 = vcmask 326656   ;;  %s1027_s1 = inlined_call_operand.vmem [shape: f32[128,256], index: 1, kind: input, shape index: {}]   ;;  %s1028_s2 = inlined_call_operand.vmem [shape: f32[256,40], index: 2, kind: input, shape index: {}]   ;;  %s1029_s0 = inlined_call_operand.vmem [shape: f32[96,128], index: 0, kind: input, shape index: {}]   ;;  %s1030_s3 = inlined_call_operand.vmem [shape: f32[40,384], index: 3, kind: input, shape index: {}]   ;;  %s1031_s4 = inlined_call_operand.vmem [shape: f32[8,128], index: 4, kind: output, shape index: {}]  }
   0x1   :  { %v60_v0 = vld [vmem:[%s1027_s1 + $0xf8] sm:$0xff]  ;;  %v59_v1 = vld [vmem:[%s1027_s1 + $0xf0] sm:$0xff]  ;;  %v58_v2 = vld [vmem:[%s1027_s1 + $0xe8] sm:$0xff]  ;;  %125 = vmatprep.mubr.f32.mxu0 %v692_v3 }
   0x2   :  { %61 = vmatprep.subr.mxu0 %v60_v0  ;;  %v57_v4 = vld [vmem:[%s1027_s1 + $0xe0] sm:$0xff]  ;;  %v56_v5 = vld [vmem:[%s1027_s1 + $0xd8] sm:$0xff]  ;;  %v55_v6 = vld [vmem:[%s1027_s1 + $0xd0] sm:$0xff] }
   0x3   :  { %62 = vmatpush1.msra.mxu0 %v59_v1  ;;  %v54_v7 = vld [vmem:[%s1027_s1 + $0xc8] sm:$0xff]  ;;  %v53_v8 = vld [vmem:[%s1027_s1 + $0xc0] sm:$0xff]  ;;  %v52_v9 = vld [vmem:[%s1027_s1 + $0xb8] sm:$0xff] }
   0x4   :  { %63 = vmatprep.subr.mxu0 %v58_v2  ;;  %v51_v10 = vld [vmem:[%s1027_s1 + $0xb0] sm:$0xff]  ;;  %v50_v11 = vld [vmem:[%s1027_s1 + $0xa8] sm:$0xff]  ;;  %v49_v12 = vld [vmem:[%s1027_s1 + $0xa0] sm:$0xff] }
   0x5   :  { %64 = vmatpush1.msra.mxu0 %v57_v4  ;;  %v48_v13 = vld [vmem:[%s1027_s1 + $0x98] sm:$0xff]  ;;  %v47_v14 = vld [vmem:[%s1027_s1 + $0x90] sm:$0xff]  ;;  %v46_v15 = vld [vmem:[%s1027_s1 + $0x88] sm:$0xff] }
   0x6   :  { %65 = vmatprep.subr.mxu0 %v56_v5  ;;  %v45_v16 = vld [vmem:[%s1027_s1 + $0x80] sm:$0xff]  ;;  %v44_v17 = vld [vmem:[%s1027_s1 + $0x78] sm:$0xff]  ;;  %v43_v18 = vld [vmem:[%s1027_s1 + $0x70] sm:$0xff] }
   0x7   :  { %66 = vmatpush1.msra.mxu0 %v55_v6  ;;  %v253_v19 = vld [vmem:[%s1028_s2 + $0xf8] sm:$0xff]  ;;  %v252_v21 = vld [vmem:[%s1028_s2 + $0xf0] sm:$0xff]  ;;  %v42_v23 = vld [vmem:[%s1027_s1 + $0x68] sm:$0xff] }
   0x8   :  { %67 = vmatprep.subr.mxu0 %v54_v7  ;;  %595 = vmatprep.subr.mxu1 %v253_v19  ;;  %v237_v20 = vld [vmem:[%s1028_s2 + $0x78] sm:$0xff]  ;;  %v236_v22 = vld [vmem:[%s1028_s2 + $0x70] sm:$0xff]  ;;  %v251_v24 = vld [vmem:[%s1028_s2 + $0xe8] sm:$0xff] }
   0x9   :  { %68 = vmatpush1.msra.mxu0 %v53_v8  ;;  %596 = vmatpush3.msra.mxu1 %v237_v20  ;;  %v41_v25 = vld [vmem:[%s1027_s1 + $0x60] sm:$0xff]  ;;  %v235_v26 = vld [vmem:[%s1028_s2 + $0x68] sm:$0xff]  ;;  %v40_v27 = vld [vmem:[%s1027_s1 + $0x58] sm:$0xff] }
   0xa   :  { %69 = vmatprep.subr.mxu0 %v52_v9  ;;  %597 = vmatprep.subr.mxu1 %v252_v21  ;;  %v250_v28 = vld [vmem:[%s1028_s2 + $0xe0] sm:$0xff]  ;;  %v39_v29 = vld [vmem:[%s1027_s1 + $0x50] sm:$0xff]  ;;  %v38_v31 = vld [vmem:[%s1027_s1 + $0x48] sm:$0xff] }
   0xb   :  { %70 = vmatpush1.msra.mxu0 %v51_v10  ;;  %598 = vmatpush3.msra.mxu1 %v236_v22  ;;  %v234_v30 = vld [vmem:[%s1028_s2 + $0x60] sm:$0xff]  ;;  %v249_v32 = vld [vmem:[%s1028_s2 + $0xd8] sm:$0xff]  ;;  %v248_v36 = vld [vmem:[%s1028_s2 + $0xd0] sm:$0xff] }
   0xc   :  { %71 = vmatprep.subr.mxu0 %v50_v11  ;;  %599 = vmatprep.subr.mxu1 %v251_v24  ;;  %v37_v33 = vld [vmem:[%s1027_s1 + $0x40] sm:$0xff]  ;;  %v233_v34 = vld [vmem:[%s1028_s2 + $0x58] sm:$0xff]  ;;  %v35_v37 = vld [vmem:[%s1027_s1 + $0x30] sm:$0xff] }
   0xd   :  { %72 = vmatpush1.msra.mxu0 %v49_v12  ;;  %600 = vmatpush3.msra.mxu1 %v235_v26  ;;  %v36_v35 = vld [vmem:[%s1027_s1 + $0x38] sm:$0xff]  ;;  %v232_v38 = vld [vmem:[%s1028_s2 + $0x50] sm:$0xff]  ;;  %v34_v39 = vld [vmem:[%s1027_s1 + $0x28] sm:$0xff] }
   0xe   :  { %73 = vmatprep.subr.mxu0 %v48_v13  ;;  %601 = vmatprep.subr.mxu1 %v250_v28  ;;  %v247_v40 = vld [vmem:[%s1028_s2 + $0xc8] sm:$0xff]  ;;  %v33_v41 = vld [vmem:[%s1027_s1 + $0x20] sm:$0xff]  ;;  %v32_v43 = vld [vmem:[%s1027_s1 + $0x18] sm:$0xff] }
   0xf   :  { %74 = vmatpush1.msra.mxu0 %v47_v14  ;;  %602 = vmatpush3.msra.mxu1 %v234_v30  ;;  %v231_v42 = vld [vmem:[%s1028_s2 + $0x48] sm:$0xff]  ;;  %v246_v44 = vld [vmem:[%s1028_s2 + $0xc0] sm:$0xff]  ;;  %v31_v45 = vld [vmem:[%s1027_s1 + $0x10] sm:$0xff] }
  0x10   :  { %75 = vmatprep.subr.mxu0 %v46_v15  ;;  %603 = vmatprep.subr.mxu1 %v249_v32  ;;  %v230_v46 = vld [vmem:[%s1028_s2 + $0x40] sm:$0xff]  ;;  %v30_v47 = vld [vmem:[%s1027_s1 + $0x8] sm:$0xff]  ;;  %v245_v48 = vld [vmem:[%s1028_s2 + $0xb8] sm:$0xff] }
  0x11   :  { %76 = vmatpush1.msra.mxu0 %v45_v16  ;;  %604 = vmatpush3.msra.mxu1 %v233_v34  ;;  %v29_v49 = vld [vmem:[%s1027_s1] sm:$0xff]  ;;  %v229_v50 = vld [vmem:[%s1028_s2 + $0x38] sm:$0xff]  ;;  %v244_v52 = vld [vmem:[%s1028_s2 + $0xb0] sm:$0xff] }
  0x12   :  { %77 = vmatprep.subr.mxu0 %v44_v17  ;;  %605 = vmatprep.subr.mxu1 %v248_v36  ;;  %v17_v51 = vld [vmem:[%s1029_s0] sm:$0xff]  ;;  %v228_v53 = vld [vmem:[%s1028_s2 + $0x30] sm:$0xff]  ;;  %v243_v54 = vld [vmem:[%s1028_s2 + $0xa8] sm:$0xff] }
  0x13   :  { %78 = vmatpush1.msra.mxu0 %v43_v18  ;;  %606 = vmatpush3.msra.mxu1 %v232_v38  ;;  %v227_v55 = vld [vmem:[%s1028_s2 + $0x28] sm:$0xff]  ;;  %v242_v57 = vld [vmem:[%s1028_s2 + $0xa0] sm:$0xff]  ;;  %v241_v59 = vld [vmem:[%s1028_s2 + $0x98] sm:$0xff] }
  0x14   :  { %79 = vmatprep.subr.mxu0 %v42_v23  ;;  %607 = vmatprep.subr.mxu1 %v247_v40  ;;  %v18_v56 = vld [vmem:[%s1029_s0 + $0x8] sm:$0xff]  ;;  %v226_v58 = vld [vmem:[%s1028_s2 + $0x20] sm:$0xff]  ;;  %v225_v60 = vld [vmem:[%s1028_s2 + $0x18] sm:$0xff] }
  0x15   :  { %80 = vmatpush1.msra.mxu0 %v41_v25  ;;  %608 = vmatpush3.msra.mxu1 %v231_v42  ;;  %v19_v61 = vld [vmem:[%s1029_s0 + $0x10] sm:$0xff]  ;;  %v20_v62 = vld [vmem:[%s1029_s0 + $0x18] sm:$0xff]  ;;  %v21_v63 = vld [vmem:[%s1029_s0 + $0x20] sm:$0xff] }
  0x16   :  { %81 = vmatprep.subr.mxu0 %v40_v27  ;;  %609 = vmatprep.subr.mxu1 %v246_v44  ;;  %v22_v0 = vld [vmem:[%s1029_s0 + $0x28] sm:$0xff]  ;;  %v23_v1 = vld [vmem:[%s1029_s0 + $0x30] sm:$0xff]  ;;  %v24_v2 = vld [vmem:[%s1029_s0 + $0x38] sm:$0xff] }
  0x17   :  { %82 = vmatpush1.msra.mxu0 %v39_v29  ;;  %610 = vmatpush3.msra.mxu1 %v230_v46  ;;  %v25_v4 = vld [vmem:[%s1029_s0 + $0x40] sm:$0xff]  ;;  %v26_v5 = vld [vmem:[%s1029_s0 + $0x48] sm:$0xff]  ;;  %v27_v6 = vld [vmem:[%s1029_s0 + $0x50] sm:$0xff] }
  0x18   :  { %83 = vmatprep.subr.mxu0 %v38_v31  ;;  %611 = vmatprep.subr.mxu1 %v245_v48  ;;  %v28_v7 = vld [vmem:[%s1029_s0 + $0x58] sm:$0xff]  ;;  %v240_v8 = vld [vmem:[%s1028_s2 + $0x90] sm:$0xff]  ;;  %v239_v10 = vld [vmem:[%s1028_s2 + $0x88] sm:$0xff] }
  0x19   :  { %84 = vmatpush1.msra.mxu0 %v37_v33  ;;  %612 = vmatpush3.msra.mxu1 %v229_v50  ;;  %v224_v9 = vld [vmem:[%s1028_s2 + $0x10] sm:$0xff]  ;;  %v223_v11 = vld [vmem:[%s1028_s2 + $0x8] sm:$0xff]  ;;  %v238_v12 = vld [vmem:[%s1028_s2 + $0x80] sm:$0xff] }
  0x1a   :  { %85 = vmatprep.subr.mxu0 %v36_v35  ;;  %613 = vmatprep.subr.mxu1 %v244_v52  ;;  %v222_v13 = vld [vmem:[%s1028_s2] sm:$0xff]  ;;  %v413_v14 = vld [vmem:[%s1030_s3 + $0x68] sm:$0xff]  ;;  %v414_v21 = vld [vmem:[%s1030_s3 + $0x70] sm:$0xff] }
  0x1b   :  { %86 = vmatpush1.msra.mxu0 %v35_v37  ;;  %614 = vmatpush3.msra.mxu1 %v228_v53  ;;  %v412_v15 = vld [vmem:[%s1030_s3 + $0x60] sm:$0xff] }
  0x1c   :  { %87 = vmatprep.subr.mxu0 %v34_v39  ;;  %615 = vmatprep.subr.mxu1 %v243_v54 }
  0x1d   :  { %88 = vmatpush1.msra.mxu0 %v33_v41  ;;  %616 = vmatpush3.msra.mxu1 %v227_v55 }
  0x1e   :  { %89 = vmatprep.subr.mxu0 %v32_v43  ;;  %617 = vmatprep.subr.mxu1 %v242_v57 }
  0x1f   :  { %90 = vmatpush1.msra.mxu0 %v31_v45  ;;  %618 = vmatpush3.msra.mxu1 %v226_v58 }
  0x20   :  { %91 = vmatprep.subr.mxu0 %v30_v47  ;;  %619 = vmatprep.subr.mxu1 %v241_v59 }
  0x21   :  { %92 = vmatpush1.msra.mxu0 %v29_v49  ;;  %620 = vmatpush3.msra.mxu1 %v225_v60 }
  0x22   :  { %126 = vmatmul.mubr.f32.vlgmr.msra.gmra.mxu0 %v17_v51  ;;  %621 = vmatprep.subr.mxu1 %v240_v8  ;;  %v404_v8 = vld [vmem:[%s1030_s3 + $0x20] sm:$0xff] }
  0x23   :  { %131 = vmatprep.mubr.f32.mxu0 %v692_v3  ;;  %622 = vmatpush3.msra.mxu1 %v224_v9  ;;  %v403_v9 = vld [vmem:[%s1030_s3 + $0x18] sm:$0xff] }
  0x24   :  { %623 = vmatprep.subr.mxu1 %v239_v10  ;;  %447 = vmatprep.subr.mxu0 %v413_v14  ;;  %v405_v10 = vld [vmem:[%s1030_s3 + $0x28] sm:$0xff] }
  0x25   :  { %624 = vmatpush3.msra.mxu1 %v223_v11  ;;  %448 = vmatpush1.msra.mxu0 %v412_v15  ;;  %v401_v11 = vld [vmem:[%s1030_s3 + $0x8] sm:$0xff] }
  0x26   :  { %132 = vmatmul.mubr.f32.gmra.mxu0 %v18_v56  ;;  %625 = vmatprep.subr.mxu1 %v238_v12  ;;  %v400_v12 = vld [vmem:[%s1030_s3] sm:$0xff] }
  0x27   :  { %137 = vmatprep.mubr.f32.mxu0 %v692_v3  ;;  %626 = vmatpush3.msra.mxu1 %v222_v13  ;;  %v402_v13 = vld [vmem:[%s1030_s3 + $0x10] sm:$0xff] }
  0x28   :  { %671 = vmatprep.subr.mxu1 %v692_v3 }
  0x2a   :  { %138 = vmatmul.mubr.f32.gmra.mxu0 %v19_v61 }
  0x2b   :  { %143 = vmatprep.mubr.f32.mxu0 %v692_v3 }
  0x2e   :  { %144 = vmatmul.mubr.f32.gmra.mxu0 %v20_v62 }
  0x2f   :  { %149 = vmatprep.mubr.f32.mxu0 %v692_v3 }
  0x32   :  { %150 = vmatmul.mubr.f32.gmra.mxu0 %v21_v63 }
  0x33   :  { %155 = vmatprep.mubr.f32.mxu0 %v692_v3 }
  0x36   :  { %156 = vmatmul.mubr.f32.gmra.mxu0 %v22_v0 }
  0x37   :  { %161 = vmatprep.mubr.f32.mxu0 %v692_v3 }
  0x3a   :  { %162 = vmatmul.mubr.f32.gmra.mxu0 %v23_v1  ;;  %v410_v1 = vld [vmem:[%s1030_s3 + $0x50] sm:$0xff] }
  0x3b   :  { %167 = vmatprep.mubr.f32.mxu0 %v692_v3  ;;  %449 = vmatprep.subr.mxu0 %v410_v1 }
  0x3e   :  { %168 = vmatmul.mubr.f32.gmra.mxu0 %v24_v2  ;;  %v409_v2 = vld [vmem:[%s1030_s3 + $0x48] sm:$0xff] }
  0x3f   :  { %173 = vmatprep.mubr.f32.mxu0 %v692_v3  ;;  %450 = vmatpush1.msra.mxu0 %v409_v2 }
  0x42   :  { %174 = vmatmul.mubr.f32.gmra.mxu0 %v25_v4  ;;  %v411_v4 = vld [vmem:[%s1030_s3 + $0x58] sm:$0xff] }
  0x43   :  { %179 = vmatprep.mubr.f32.mxu0 %v692_v3 }
  0x46   :  { %180 = vmatmul.mubr.f32.gmra.mxu0 %v26_v5  ;;  %v407_v5 = vld [vmem:[%s1030_s3 + $0x38] sm:$0xff] }
  0x47   :  { %185 = vmatprep.mubr.f32.mxu0 %v692_v3  ;;  %451 = vmatprep.subr.mxu0 %v407_v5 }
  0x4a   :  { %186 = vmatmul.mubr.f32.gmra.mxu0 %v27_v6  ;;  %v406_v6 = vld [vmem:[%s1030_s3 + $0x30] sm:$0xff] }
  0x4b   :  { %191 = vmatprep.mubr.f32.mxu0 %v692_v3  ;;  %452 = vmatpush1.msra.mxu0 %v406_v6 }
  0x4c   :  { %453 = vmatprep.subr.mxu0 %v404_v8 }
  0x4d   :  { %454 = vmatpush1.msra.mxu0 %v403_v9 }
  0x4e   :  { %192 = vmatmul.mubr.f32.gmra.mxu0 %v28_v7  ;;  %v408_v7 = vld [vmem:[%s1030_s3 + $0x40] sm:$0xff]  ;;  %455 = vmatprep.subr.mxu0 %v401_v11 }
  0x4f   :  { %489 = vmatprep.mubr.f32.mxu0 %v692_v3  ;;  %456 = vmatpush1.msra.mxu0 %v400_v12 }
  0xe2   :  { %v127_v16 = vpop.f32.mrf.mxu0 }
  0xe3   :  { %v198_v19 = vmax.f32 %v127_v16, 0.0 }
  0xe4   :  { %v129_v17 = vpop.f32.mrf.mxu0 }
  0xe5   :  { %v199_v18 = vmax.f32 %v129_v17, 0.0 }
  0xe6   :  { %v133_v20 = vpop.f32.mrf.mxu0 }
  0xe7   :  { %318 = vmatprep.mubr.f32.mxu1 %v199_v18  ;;  %v200_v24 = vmax.f32 %v133_v20, 0.0 }
  0xe8   :  { %v135_v22 = vpop.f32.mrf.mxu0  ;;  %319 = vmatmul.mubr.f32.vlgmr.msra.gmra.mxu1 %v198_v19 }
  0xe9   :  { %v201_v23 = vmax.f32 %v135_v22, 0.0  ;;  %672 = vmatpush3.msra.mxu1 %v414_v21 }
  0xea   :  { %v139_v25 = vpop.f32.mrf.mxu0  ;;  %673 = vmatprep.subr.mxu1 %v692_v3 }
  0xeb   :  { %323 = vmatprep.mubr.f32.mxu1 %v201_v23  ;;  %v202_v28 = vmax.f32 %v139_v25, 0.0  ;;  %674 = vmatpush3.msra.mxu1 %v411_v4 }
  0xec   :  { %v141_v26 = vpop.f32.mrf.mxu0  ;;  %324 = vmatmul.mubr.f32.gmra.mxu1 %v200_v24  ;;  %675 = vmatprep.subr.mxu1 %v692_v3 }
  0xed   :  { %v203_v27 = vmax.f32 %v141_v26, 0.0  ;;  %676 = vmatpush3.msra.mxu1 %v408_v7 }
  0xee   :  { %v145_v29 = vpop.f32.mrf.mxu0  ;;  %677 = vmatprep.subr.mxu1 %v692_v3 }
  0xef   :  { %328 = vmatprep.mubr.f32.mxu1 %v203_v27  ;;  %v204_v32 = vmax.f32 %v145_v29, 0.0  ;;  %678 = vmatpush3.msra.mxu1 %v405_v10 }
  0xf0   :  { %v147_v30 = vpop.f32.mrf.mxu0  ;;  %329 = vmatmul.mubr.f32.gmra.mxu1 %v202_v28  ;;  %679 = vmatprep.subr.mxu1 %v692_v3 }
  0xf1   :  { %v205_v31 = vmax.f32 %v147_v30, 0.0  ;;  %680 = vmatpush3.msra.mxu1 %v402_v13 }
  0xf2   :  { %v151_v33 = vpop.f32.mrf.mxu0 }
  0xf3   :  { %333 = vmatprep.mubr.f32.mxu1 %v205_v31  ;;  %v206_v36 = vmax.f32 %v151_v33, 0.0 }
  0xf4   :  { %v153_v34 = vpop.f32.mrf.mxu0  ;;  %334 = vmatmul.mubr.f32.gmra.mxu1 %v204_v32 }
  0xf5   :  { %v207_v35 = vmax.f32 %v153_v34, 0.0 }
  0xf6   :  { %v157_v37 = vpop.f32.mrf.mxu0 }
  0xf7   :  { %338 = vmatprep.mubr.f32.mxu1 %v207_v35  ;;  %v208_v40 = vmax.f32 %v157_v37, 0.0 }
  0xf8   :  { %v159_v38 = vpop.f32.mrf.mxu0  ;;  %339 = vmatmul.mubr.f32.gmra.mxu1 %v206_v36 }
  0xf9   :  { %v209_v39 = vmax.f32 %v159_v38, 0.0 }
  0xfa   :  { %v163_v41 = vpop.f32.mrf.mxu0 }
  0xfb   :  { %343 = vmatprep.mubr.f32.mxu1 %v209_v39  ;;  %v210_v44 = vmax.f32 %v163_v41, 0.0 }
  0xfc   :  { %v165_v42 = vpop.f32.mrf.mxu0  ;;  %344 = vmatmul.mubr.f32.gmra.mxu1 %v208_v40 }
  0xfd   :  { %v211_v43 = vmax.f32 %v165_v42, 0.0 }
  0xfe   :  { %v169_v45 = vpop.f32.mrf.mxu0 }
  0xff   :  { %348 = vmatprep.mubr.f32.mxu1 %v211_v43  ;;  %v212_v48 = vmax.f32 %v169_v45, 0.0 }
 0x100   :  { %v171_v46 = vpop.f32.mrf.mxu0  ;;  %349 = vmatmul.mubr.f32.gmra.mxu1 %v210_v44 }
 0x101   :  { %v213_v47 = vmax.f32 %v171_v46, 0.0 }
 0x102   :  { %v175_v49 = vpop.f32.mrf.mxu0 }
 0x103   :  { %353 = vmatprep.mubr.f32.mxu1 %v213_v47  ;;  %v214_v52 = vmax.f32 %v175_v49, 0.0 }
 0x104   :  { %v177_v50 = vpop.f32.mrf.mxu0  ;;  %354 = vmatmul.mubr.f32.gmra.mxu1 %v212_v48 }
 0x105   :  { %v215_v51 = vmax.f32 %v177_v50, 0.0 }
 0x106   :  { %v181_v53 = vpop.f32.mrf.mxu0 }
 0x107   :  { %358 = vmatprep.mubr.f32.mxu1 %v215_v51  ;;  %v216_v56 = vmax.f32 %v181_v53, 0.0 }
 0x108   :  { %v183_v54 = vpop.f32.mrf.mxu0  ;;  %359 = vmatmul.mubr.f32.gmra.mxu1 %v214_v52 }
 0x109   :  { %v217_v55 = vmax.f32 %v183_v54, 0.0 }
 0x10a   :  { %v187_v57 = vpop.f32.mrf.mxu0 }
 0x10b   :  { %363 = vmatprep.mubr.f32.mxu1 %v217_v55  ;;  %v218_v60 = vmax.f32 %v187_v57, 0.0 }
 0x10c   :  { %v189_v58 = vpop.f32.mrf.mxu0  ;;  %364 = vmatmul.mubr.f32.gmra.mxu1 %v216_v56 }
 0x10d   :  { %v219_v59 = vmax.f32 %v189_v58, 0.0 }
 0x10e   :  { %v193_v61 = vpop.f32.mrf.mxu0 }
 0x10f   :  { %368 = vmatprep.mubr.f32.mxu1 %v219_v59  ;;  %v220_v0 = vmax.f32 %v193_v61, 0.0 }
 0x110   :  { %v195_v62 = vpop.f32.mrf.mxu0  ;;  %369 = vmatmul.mubr.f32.gmra.mxu1 %v218_v60 }
 0x111   :  { %v221_v63 = vmax.f32 %v195_v62, 0.0 }
 0x113   :  { %373 = vmatprep.mubr.f32.mxu1 %v221_v63 }
 0x114   :  { %374 = vmatmul.mubr.f32.gmra.mxu1 %v220_v0 }
 0x115   :  { %681 = vmatprep.mubr.msk.f32.mxu1 %vm693_vm0, %v692_v3 }
 0x1a8   :  { %v627_v14 = vpop.f32.mrf.mxu1 }
 0x1aa   :  { %v628_v15 = vpop.f32.mrf.mxu1 }
 0x1ab   :  { %v629_v33 = vadd.f32 %v628_v15, %v627_v14 }
 0x1ac   :  { %v630_v16 = vpop.f32.mrf.mxu1 }
 0x1ad   :  { %v379_v40 = vmax.f32 %v629_v33, 0.0 }
 0x1ae   :  { %v631_v17 = vpop.f32.mrf.mxu1 }
 0x1af   :  { %v632_v41 = vadd.f32 %v631_v17, %v630_v16 }
 0x1b0   :  { %v633_v18 = vpop.f32.mrf.mxu1 }
 0x1b1   :  { %v380_v52 = vmax.f32 %v632_v41, 0.0 }
 0x1b2   :  { %v634_v19 = vpop.f32.mrf.mxu1 }
 0x1b3   :  { %v635_v53 = vadd.f32 %v634_v19, %v633_v18 }
 0x1b4   :  { %v636_v20 = vpop.f32.mrf.mxu1 }
 0x1b5   :  { %v381_v0 = vmax.f32 %v635_v53, 0.0 }
 0x1b6   :  { %v637_v21 = vpop.f32.mrf.mxu1 }
 0x1b7   :  { %v638_v31 = vadd.f32 %v637_v21, %v636_v20 }
 0x1b8   :  { %v639_v22 = vpop.f32.mrf.mxu1 }
 0x1b9   :  { %v382_v36 = vmax.f32 %v638_v31, 0.0 }
 0x1ba   :  { %v640_v23 = vpop.f32.mrf.mxu1 }
 0x1bb   :  { %v641_v38 = vadd.f32 %v640_v23, %v639_v22  ;;  %v391_v46 = vmax.f32 %v379_v40, %v382_v36 }
 0x1bc   :  { %v642_v24 = vpop.f32.mrf.mxu1 }
 0x1bd   :  { %v383_v48 = vmax.f32 %v641_v38, 0.0 }
 0x1be   :  { %v643_v25 = vpop.f32.mrf.mxu1 }
 0x1bf   :  { %v644_v49 = vadd.f32 %v643_v25, %v642_v24  ;;  %v392_v60 = vmax.f32 %v380_v52, %v383_v48 }
 0x1c0   :  { %v645_v26 = vpop.f32.mrf.mxu1 }
 0x1c1   :  { %v384_v61 = vmax.f32 %v644_v49, 0.0 }
 0x1c2   :  { %v646_v27 = vpop.f32.mrf.mxu1 }
 0x1c3   :  { %v647_v35 = vadd.f32 %v646_v27, %v645_v26  ;;  %v393_v5 = vmax.f32 %v381_v0, %v384_v61 }
 0x1c4   :  { %v648_v28 = vpop.f32.mrf.mxu1 }
 0x1c5   :  { %v385_v43 = vmax.f32 %v647_v35, 0.0 }
 0x1c6   :  { %v649_v29 = vpop.f32.mrf.mxu1 }
 0x1c7   :  { %v650_v44 = vadd.f32 %v649_v29, %v648_v28 }
 0x1c8   :  { %v651_v30 = vpop.f32.mrf.mxu1 }
 0x1c9   :  { %v386_v55 = vmax.f32 %v650_v44, 0.0 }
 0x1ca   :  { %v652_v32 = vpop.f32.mrf.mxu1 }
 0x1cb   :  { %v653_v56 = vadd.f32 %v652_v32, %v651_v30 }
 0x1cc   :  { %v654_v34 = vpop.f32.mrf.mxu1 }
 0x1cd   :  { %v387_v1 = vmax.f32 %v653_v56, 0.0 }
 0x1ce   :  { %v655_v37 = vpop.f32.mrf.mxu1 }
 0x1cf   :  { %v656_v39 = vadd.f32 %v655_v37, %v654_v34 }
 0x1d0   :  { %v657_v42 = vpop.f32.mrf.mxu1 }
 0x1d1   :  { %v388_v45 = vmax.f32 %v656_v39, 0.0 }
 0x1d2   :  { %v658_v47 = vpop.f32.mrf.mxu1 }
 0x1d3   :  { %v394_v50 = vmax.f32 %v385_v43, %v388_v45  ;;  %v659_v51 = vadd.f32 %v658_v47, %v657_v42 }
 0x1d4   :  { %v660_v54 = vpop.f32.mrf.mxu1 }
 0x1d5   :  { %v397_v57 = vmax.f32 %v391_v46, %v394_v50  ;;  %v389_v58 = vmax.f32 %v659_v51, 0.0 }
 0x1d6   :  { %v661_v59 = vpop.f32.mrf.mxu1 }
 0x1d7   :  { %v395_v62 = vmax.f32 %v386_v55, %v389_v58  ;;  %v662_v63 = vadd.f32 %v661_v59, %v660_v54  ;;  %589 = vmatmul.mubr.msk.f32.vlgmr.msra.gmra.mxu0 %vm415_vm1, %v397_v57  ;;  %682 = vmatmul.mubr.msk.f32.vlgmr.msra.gmra.mxu1 %vm415_vm1, %v397_v57 }
 0x1d8   :  { %494 = vmatprep.mubr.f32.mxu0 %v692_v3  ;;  %684 = vmatprep.mubr.msk.f32.mxu1 %vm693_vm0, %v692_v3 }
 0x1d9   :  { %v398_v2 = vmax.f32 %v392_v60, %v395_v62  ;;  %v390_v4 = vmax.f32 %v662_v63, 0.0 }
 0x1db   :  { %v396_v6 = vmax.f32 %v387_v1, %v390_v4  ;;  %590 = vmatmul.mubr.msk.f32.gmra.mxu0 %vm415_vm1, %v398_v2  ;;  %685 = vmatmul.mubr.msk.f32.gmra.mxu1 %vm415_vm1, %v398_v2 }
 0x1dc   :  { %499 = vmatprep.mubr.f32.mxu0 %v692_v3  ;;  %687 = vmatprep.mubr.msk.f32.mxu1 %vm693_vm0, %v692_v3 }
 0x1dd   :  { %v399_v7 = vmax.f32 %v393_v5, %v396_v6 }
 0x1df   :  { %591 = vmatmul.mubr.msk.f32.gmra.mxu0 %vm415_vm1, %v399_v7  ;;  %688 = vmatmul.mubr.msk.f32.gmra.mxu1 %vm415_vm1, %v399_v7 }
 0x297   :  { %v491_v8 = vpop.f32.mrf.mxu0  ;;  %v570_v9 = vpop.f32.mrf.mxu1 }
 0x299   :  { %v493_v10 = vpop.f32.mrf.mxu0  ;;  %v683_v11 = vpop.f32.mrf.mxu1 }
 0x29b   :  { %v496_v12 = vpop.f32.mrf.mxu0  ;;  %v574_v13 = vpop.f32.mrf.mxu1 }
 0x29d   :  { %v497_v14 = vpop.f32.mrf.mxu0  ;;  %v686_v15 = vpop.f32.mrf.mxu1 }
 0x29e   :  { %v582_v16 = vadd.f32 %v497_v14, %v491_v8 }
 0x29f   :  { %v501_v17 = vpop.f32.mrf.mxu0  ;;  %v578_v18 = vpop.f32.mrf.mxu1 }
 0x2a0   :  { %v583_v19 = vadd.f32 %v582_v16, %v578_v18 }
 0x2a1   :  { %v502_v20 = vpop.f32.mrf.mxu0  ;;  %v689_v21 = vpop.f32.mrf.mxu1 }
 0x2a2   :  { %584 = vst [vmem:[%s1031_s4] sm:$0xff] %v583_v19 }

</bundles_post_ra>
